<compile_context>
chip_gen: v7x
topology: tpu7x:2x2x1
jax: 0.10.0
libtpu: 0.0.40
codegen_flags: <defaults>
</compile_context>

<pallas_src>
import functools

import jax
import jax.numpy as jnp
from jax.experimental import pallas as pl
from jax.experimental.pallas import tpu as pltpu

_MAX_TM = 512    # multiple of 16 -> bf16 sublane packing friendly
_MAX_TN = 2048   # multiple of 256 -> matches v6e/v7x 256x256 MXU (128 ok on v5e)
_MAX_TK = 1024   # multiple of 256


def _round_up(x, m):
    return ((x + m - 1) // m) * m


def _choose_tk(k):
    return k if k <= _MAX_TK else _MAX_TK


def _single_k_kernel(x_ref, w_ref, o_ref, *, scale):
    # Whole K reduction in one MXU pass: no f32 scratch, no extra VMEM copy.
    acc = jnp.dot(x_ref[...], w_ref[...], preferred_element_type=jnp.float32)
    o_ref[...] = (acc * scale).astype(o_ref.dtype)


def _multi_k_kernel(x_ref, w_ref, o_ref, acc_ref, *, scale):
    k = pl.program_id(2)

    @pl.when(k == 0)
    def _():
        acc_ref[...] = jnp.zeros_like(acc_ref)

    acc_ref[...] += jnp.dot(x_ref[...], w_ref[...],
                            preferred_element_type=jnp.float32)

    @pl.when(k == pl.num_programs(2) - 1)
    def _():
        # Metric-learning scale applied exactly once, on the f32 accumulator.
        o_ref[...] = (acc_ref[...] * scale).astype(o_ref.dtype)


def prepare_weight(weight, compute_dtype=jnp.bfloat16):
    """One-time weight prep: [num_classes, C_in] -> [Kp, num_classes].

    Transpose so K contracts on sublanes / N lands on lanes, cast to the MXU
    compute dtype, and zero-pad K only when the reduction has to be split."""
    num_classes, c_in = weight.shape
    del num_classes
    w_t = jnp.asarray(weight).T.astype(compute_dtype)   # [C_in, num_classes]
    tk = _choose_tk(c_in)
    kp = _round_up(c_in, tk)
    if kp != c_in:
        w_t = jnp.pad(w_t, ((0, kp - c_in), (0, 0)))
    return w_t


def metric_linear_forward(logits, w_prepared, *, scale=1.0):
    """(logits @ weight.T) * scale, with w_prepared = prepare_weight(weight)."""
    *lead, c_in = logits.shape
    x = logits.reshape(-1, c_in)
    b = x.shape[0]
    kp, n = w_prepared.shape
    assert kp >= c_in, "prepared weight K dim smaller than logits channels"

    compute_dtype = w_prepared.dtype
    out_dtype = logits.dtype

    # --- K tiling (only dim we ever zero-pad; zeros keep the sum exact) -----
    tk = _choose_tk(kp)
    assert kp % tk == 0
    grid_k = kp // tk

    x = x.astype(compute_dtype)
    if kp != c_in:
        x = jnp.pad(x, ((0, 0), (0, kp - c_in)))

    # --- M tiling: whole batch resident when small (weight-streaming regime) -
    tm = b if b <= _MAX_TM else _MAX_TM
    grid_m = pl.cdiv(b, tm)

    # --- N tiling: full head when it fits, else lane/MXU-aligned tiles ------
    tn = n if n <= _MAX_TN else _MAX_TN
    grid_n = pl.cdiv(n, tn)

    # v7x megacore: keep >= 2 tiles along a parallel axis so both TCs get work.
    if grid_m == 1 and grid_n == 1 and n >= 512:
        tn = _round_up(pl.cdiv(n, 2), 256)
        grid_n = pl.cdiv(n, tn)

    in_bytes = jnp.dtype(compute_dtype).itemsize
    out_bytes = jnp.dtype(out_dtype).itemsize

    if grid_k == 1:
        kernel = functools.partial(_single_k_kernel, scale=float(scale))
        scratch = []
        acc_bytes = 0
    else:
        kernel = functools.partial(_multi_k_kernel, scale=float(scale))
        scratch = [pltpu.VMEM((tm, tn), jnp.float32)]
        acc_bytes = tm * tn * 4

    # Double-buffered tile footprint; let tiles grow past the 32 MiB scoped
    # default but stay under the v7x 64 MiB physical VMEM.
    footprint = (2 * (tm * tk * in_bytes + tk * tn * in_bytes
                      + tm * tn * out_bytes) + acc_bytes)
    vmem_limit = min(max(2 * footprint, 32 * 1024 * 1024), 48 * 1024 * 1024)

    # Actual tiled HBM traffic: x streamed once per j tile, w once per i tile.
    cost = pl.CostEstimate(
        flops=2 * b * n * c_in,
        transcendentals=0,
        bytes_accessed=(grid_n * b * kp * in_bytes
                        + grid_m * kp * n * in_bytes
                        + b * n * out_bytes),
    )

    out = pl.pallas_call(
        kernel,
        out_shape=jax.ShapeDtypeStruct((b, n), out_dtype),
        grid_spec=pltpu.PrefetchScalarGridSpec(
            num_scalar_prefetch=0,
            grid=(grid_m, grid_n, grid_k),
            in_specs=[
                pl.BlockSpec((tm, tk), lambda i, j, k: (i, k)),
                pl.BlockSpec((tk, tn), lambda i, j, k: (k, j)),
            ],
            out_specs=pl.BlockSpec((tm, tn), lambda i, j, k: (i, j)),
            scratch_shapes=scratch,
        ),
        compiler_params=pltpu.CompilerParams(
            dimension_semantics=("parallel", "parallel", "arbitrary"),
            vmem_limit_bytes=vmem_limit,
        ),
        cost_estimate=cost,
    )(x, w_prepared)

    return out.reshape(*lead, n)


class MetricLinear:
    """Pallas TPU equivalent of the PyTorch metric `Linear` head."""

    def __init__(self, weight, scale=1.0, margin=0.0,
                 compute_dtype=jnp.bfloat16):
        self.num_classes, self.in_channels = weight.shape
        self.scale = float(scale)
        self.margin = float(margin)        # unused in forward (matches PyTorch)
        # Weight is a static parameter: transpose / cast / K-pad exactly once.
        self.w_prepared = prepare_weight(weight, compute_dtype)

    def __call__(self, logits, targets=None):
        del targets                        # unused in forward (matches PyTorch)
        return metric_linear_forward(logits, self.w_prepared, scale=self.scale)


if __name__ == "__main__":
    key = jax.random.PRNGKey(0)
    k_x, k_w, k_t, k_x2, k_w2 = jax.random.split(key, 5)

    # --- small shapes consistent with the module ----------------------------
    batch, in_channels, num_classes, scale = 8, 32, 16, 2.5
    weight = jax.random.normal(k_w, (num_classes, in_channels), jnp.float32) * 0.02
    logits = jax.random.normal(k_x, (batch, in_channels), jnp.float32)
    targets = jax.random.randint(k_t, (batch,), 0, num_classes)   # unused in fwd

    layer = MetricLinear(weight, scale=scale)
    out = jax.block_until_ready(layer(logits, targets))
    assert out.shape == (batch, num_classes)

    # Reference with the same bf16 inputs / f32 accumulation as the kernel,
    # plus a loose sanity check against the pure-f32 PyTorch semantics.
    ref_bf16 = jnp.dot(logits.astype(jnp.bfloat16),
                       weight.T.astype(jnp.bfloat16),
                       preferred_element_type=jnp.float32) * scale
    ref_f32 = (logits @ weight.T) * scale
    assert jnp.allclose(out, ref_bf16, atol=2e-3, rtol=2e-3)
    assert jnp.allclose(out, ref_f32, atol=5e-2, rtol=5e-2)

    # --- second check exercising the split-K (multi-tile reduction) path ----
    b2, c2, n2, s2 = 16, 1536, 384, 1.0
    w2 = jax.random.normal(k_w2, (n2, c2), jnp.float32) * 0.02
    x2 = jax.random.normal(k_x2, (b2, c2), jnp.float32)
    out2 = jax.block_until_ready(MetricLinear(w2, scale=s2)(x2))
    ref2 = jnp.dot(x2.astype(jnp.bfloat16), w2.T.astype(jnp.bfloat16),
                   preferred_element_type=jnp.float32) * s2
    assert out2.shape == (b2, n2)
    assert jnp.allclose(out2, ref2, atol=5e-3, rtol=5e-3)

    print("KERNEL_OK")
</pallas_src>

<mosaic_0001>
module attributes {stable_mosaic.version = 11 : i64} {
  func.func @_single_k_kernel(%arg0: i32, %arg1: i32, %arg2: i32, %arg3: memref<8x32xbf16, #tpu.memory_space<vmem>>, %arg4: memref<32x16xbf16, #tpu.memory_space<vmem>>, %arg5: memref<8x16xf32, #tpu.memory_space<vmem>>) attributes {dimension_semantics = [#tpu.dimension_semantics<parallel>, #tpu.dimension_semantics<parallel>, #tpu.dimension_semantics<arbitrary>], iteration_bounds = array<i64: 1, 1, 1>, scalar_prefetch = 0 : i64, scratch_operands = 0 : i64, tpu.core_type = #tpu.core_type<tc>, window_params = [{transform_indices = @transform_0, window_bounds = array<i64: 8, 32>}, {transform_indices = @transform_1, window_bounds = array<i64: 32, 16>}, {transform_indices = @transform_2, window_bounds = array<i64: 8, 16>}]} {
    %c0 = arith.constant 0 : index
    %c0_0 = arith.constant 0 : index
    %0 = vector.load %arg3[%c0, %c0_0] : memref<8x32xbf16, #tpu.memory_space<vmem>>, vector<8x32xbf16>
    %c0_1 = arith.constant 0 : index
    %c0_2 = arith.constant 0 : index
    %1 = vector.load %arg4[%c0_1, %c0_2] : memref<32x16xbf16, #tpu.memory_space<vmem>>, vector<32x16xbf16>
    %cst = arith.constant dense<0.000000e+00> : vector<8x16xf32>
    %2 = tpu.matmul %0, %1, %cst {dimension_numbers = #tpu.dot_dimension_numbers<[1], [0], [0], [1], [0, 0, 1, 1], [], []>} : vector<8x32xbf16>, vector<32x16xbf16>, vector<8x16xf32> -> vector<8x16xf32>
    %cst_3 = arith.constant 2.500000e+00 : f32
    %3 = vector.broadcast %cst_3 : f32 to vector<8x16xf32>
    %4 = arith.mulf %2, %3 : vector<8x16xf32>
    %c0_4 = arith.constant 0 : index
    %c0_5 = arith.constant 0 : index
    %5 = vector.load %arg5[%c0_4, %c0_5] : memref<8x16xf32, #tpu.memory_space<vmem>>, vector<8x16xf32>
    tpu.vector_store %arg5[%c0_4, %c0_5], %4 {strides = array<i32>} : memref<8x16xf32, #tpu.memory_space<vmem>>, vector<8x16xf32>,
    return
  }
  func.func @transform_0(%arg0: i32, %arg1: i32, %arg2: i32) -> (i32, i32) {
    %c0_i32 = arith.constant 0 : i32
    return %arg0, %arg2 : i32, i32
  }
  func.func @transform_1(%arg0: i32, %arg1: i32, %arg2: i32) -> (i32, i32) {
    %c0_i32 = arith.constant 0 : i32
    return %arg2, %arg1 : i32, i32
  }
  func.func @transform_2(%arg0: i32, %arg1: i32, %arg2: i32) -> (i32, i32) {
    %c0_i32 = arith.constant 0 : i32
    return %arg0, %arg1 : i32, i32
  }
}

</mosaic_0001>

<bundles_post_ra>
// kernel: tpu_custom_call.1
= control target key start
LH: loop header
LB: loop body
LE: loop exit
PB: predicated region body
PF: predicated region fallthrough
CT: control target
= control target key end

     0   :  { %v134_v1 = vmov 0.0   ;;  %vm135_vm0 = vmmov 0   ;;  %s173_s0 = inlined_call_operand.vmem [shape: bf16[8,32], index: 0, kind: input, shape index: {}]   ;;  %s174_s1 = inlined_call_operand.vmem [shape: bf16[32,16], index: 1, kind: input, shape index: {}]   ;;  %s175_s2 = inlined_call_operand.hbm [shape: f32[8,16], index: 2, kind: output, shape index: {}]  }
   0x1   :  { %v108_v0 = vld [vmem:[%s174_s1] sm:$0xff]   ;;  %97 = vmatprep.subr.bf16.mxu0 %v134_v1  ;;  %v109_v2 = vld [vmem:[%s174_s1 + $0x8] sm:$0xff]   ;;  %101 = vmatprep.mubr.msk.bf16.mxu0 %vm135_vm0, %v134_v1 }
   0x2   :  { %98 = vmatpush3.bf16.msra.mxu0 %v108_v0 }
   0x3   :  { %7 = vsyncpa [#allocation3], 0  ;;  %99 = vmatprep.subr.bf16.mxu0 %v134_v1  ;;  %v13_v3 = vld [vmem:[%s173_s0] sm:$0xf]  ;;  %vm30_vm1 = vcmask 261120   ;;  %s136_s15 = smov [#allocation2]  }
   0x4   :  { %s83_s16 = sshll.u32 %s136_s15, 4  ;;  %vm75_vm2 = vcmask 130048   ;;  %s84_s16 = int_to_ptr.vmem [resolvable:$true] %s83_s16 }
   0x5   :  { %s110_s1 = scalar_lea.vmem %s84_s16, 128  ;;  %p115_p1 = scmp.lt.s32.totalorder %s84_s16, %s84_s16 }
   0x6   :  { %100 = vmatpush3.bf16.msra.mxu0 %v109_v2  ;;  %p111_p0 = scmp.ne.s32.totalorder %s84_s16, %s110_s1  ;;  %p116_p2 = scmp.lt.s32.totalorder %s110_s1, %s110_s1 }
   0x8   :  { %p117_p3 = por %p116_p2, %p115_p1 }
   0x9   :  { %102 = vmatmul.mubr.msk.bf16.vlgmr.msra.gmra.mrb[0].mxu0 %vm30_vm1, %v13_v3 }
   0xa   :  { %p118_p4 = pnand %p117_p3, %p111_p0 }
  0xdc   :  { %v68_v4 = vpop.f32.mrb[0].mxu0 }
  0xdd   :  { %v74_v5 = vmul.f32 2.5, %v68_v4  ;;  %v103_v6 = vpop.f32.mrb[1].mxu0 }
  0xde   :  { %v71_v7 = vpop.f32.mrb[2].mxu0 }
  0xdf   :  { %v104_v8 = vpop.f32.mrb[3].mxu0  ;;  %76 = vst.msk [vmem:[#allocation2] sm:$0xff] %vm75_vm2, %v74_v5 }
  0xe0   :  { %121 = shalt.err (!%p118_p4)
}
  0xe1   :  { %s122_s18 = scalar_lea.hbm %s175_s2, 128 }
  0xe2   :  { %p123_p5 = scmp.ne.s32.totalorder %s175_s2, %s122_s18  ;;  %p126_p6 = scmp.lt.u32.totalorder %s122_s18, %s175_s2 }
  0xe4   :  { %p128_p7 = pnand %p126_p6, %p123_p5 }
  0xe6   :  { %131 = shalt.err (!%p128_p7)
}
  0xe7   :  { %86 = dma.vmem_to_hbm [thread:$0]  %s84_s16, 128, %s175_s2, [#allocation3]  }
  0xe8   :  { %132 = dma.done.wait [#allocation3], 128  }
  0xe9   :  { %133 = vsyncadd [#allocation3], 4294967168 }
  0xea   :  { %90 = vsyncpa [#allocation3], 1 }

</bundles_post_ra>
